<compile_context>
chip_gen: v7x
topology: tpu7x:2x2x1
jax: 0.10.0
libtpu: 0.0.40
codegen_flags: <defaults>
</compile_context>

<pallas_src>
import functools

import jax
import jax.numpy as jnp
from jax.experimental import pallas as pl
from jax.experimental.pallas import tpu as pltpu


def _yolo_loss_kernel(anc_ref, box_ref, conf_ref, cls_ref, tgt_ref, out_ref, *,
                      accumulate):
    """Lane-dense YOLO loss tile (B*A blocked).

    All refs carry the spatial axis (TL grid cells) on the lane (last) dim, the
    small feature axis on sublanes, and TBA (batch*anchor rows) as the leading
    block dim:
      anc_ref  : (TBA, 2, 1)   scaled anchor (w, h) per row
      box_ref  : (TBA, 5, TL)  raw [tx, ty, tw, th, <unused>]
      conf_ref : (TBA, 1, TL)  objectness logit
      cls_ref  : (TBA, C, TL)  class logits
      tgt_ref  : (TBA, 6, TL)  [conf, cls, x, y, w, h]
      out_ref  : (TBA, 1, TL)  per-lane partial loss sums (f32); resident across
                               the spatial-tile (reduction) grid axis iff
                               accumulate=True.
    """
    box = box_ref[...].astype(jnp.float32)
    conf = conf_ref[...].astype(jnp.float32)
    cls_logits = cls_ref[...].astype(jnp.float32)
    tgt = tgt_ref[...].astype(jnp.float32)
    anc = anc_ref[...].astype(jnp.float32)               # (TBA, 2, 1)

    # --- box decode (EUP-heavy sigmoid/exp on dense lanes) -------------------
    pred_xy = jax.nn.sigmoid(box[:, 0:2, :])              # (TBA, 2, TL)
    pred_wh = jnp.exp(box[:, 2:4, :]) * anc                # (TBA, 2, TL)

    tgt_conf = tgt[:, 0:1, :]                              # (TBA, 1, TL)
    tgt_cls = tgt[:, 1:2, :]                               # (TBA, 1, TL)
    tgt_xy = tgt[:, 2:4, :]                                # (TBA, 2, TL)
    tgt_wh = tgt[:, 4:6, :]                                # (TBA, 2, TL)

    # --- confidence loss: BCE with logits -------------------------------------
    # obj_mask * L + (1 - obj_mask) * L == L, so the masks cancel exactly.
    # (log(1+exp(-|z|)) kept instead of log1p for lowering robustness; the
    #  difference is far below the verification tolerance.)
    z = conf
    conf_loss = (jnp.maximum(z, 0.0) - z * tgt_conf
                 + jnp.log(1.0 + jnp.exp(-jnp.abs(z))))    # (TBA, 1, TL)

    # --- localization loss: masked MSE over the 4 box coords ------------------
    obj = tgt_conf
    d_xy = (pred_xy - tgt_xy) * obj
    d_wh = (pred_wh - tgt_wh) * obj
    loc_loss = jnp.sum(d_xy * d_xy + d_wh * d_wh,
                       axis=1, keepdims=True)              # (TBA, 1, TL)

    # --- classification loss: softmax CE vs. integer class --------------------
    m = jnp.max(cls_logits, axis=1, keepdims=True)
    lse = m + jnp.log(jnp.sum(jnp.exp(cls_logits - m), axis=1, keepdims=True))
    cls_idx = jax.lax.broadcasted_iota(jnp.int32, cls_logits.shape, 1)
    onehot = (cls_idx == tgt_cls.astype(jnp.int32)).astype(jnp.float32)
    picked = jnp.sum(cls_logits * onehot, axis=1, keepdims=True)
    cls_loss = lse - picked                                # (TBA, 1, TL)

    total = conf_loss + loc_loss + cls_loss

    if accumulate:
        @pl.when(pl.program_id(1) == 0)
        def _():
            out_ref[...] = jnp.zeros_like(out_ref)
        out_ref[...] += total
    else:
        # Single spatial tile: write directly, skip zero-init + RMW pass.
        out_ref[...] = total


# Lane-tile cap: keeps double-buffered (12+C) x TL slabs well inside every
# generation's scoped-VMEM defaults (v7x has only 64 MiB physical VMEM).
_MAX_TL = 4096


def _choose_lane_tile(GG):
    if GG <= _MAX_TL:
        return GG                        # block dim == full dim -> always legal
    tl = (_MAX_TL // 128) * 128
    while tl > 0 and GG % tl != 0:
        tl -= 128
    assert tl > 0, f"G*G={GG} must have a multiple-of-128 divisor <= {_MAX_TL}"
    return tl


def _choose_ba_tile(BA, TL, C, *, tba_max=8, budget_bytes=8 << 20):
    """Pick the B*A block so double-buffered inputs fit a conservative budget,
    and keep the 'parallel' grid axis >= 2 steps when possible (v7x megacore)."""
    per_row = (5 + 1 + C + 6) * TL * 4              # f32 worst-case bytes / row
    divs = [d for d in range(1, BA + 1) if BA % d == 0]
    tba = 1
    for d in divs:
        if d <= tba_max and 2 * d * per_row <= budget_bytes:
            tba = d
    if BA // tba < 2:
        alt = [d for d in divs if d < tba and BA // d >= 2]
        if alt:
            tba = alt[-1]
    return tba


class YOLOv3LossPallas:
    def __init__(self, num_classes, anchors, img_size=416):
        self.num_classes = int(num_classes)
        self.anchors = jnp.asarray(anchors, dtype=jnp.float32)      # (A, 2)
        self.num_anchors = int(self.anchors.shape[0])
        self.img_size = float(img_size)

    def __call__(self, predictions, targets):
        pred_boxes, pred_conf, pred_cls = predictions
        B = pred_boxes.shape[0]
        G = pred_boxes.shape[3]
        A = self.num_anchors
        C = self.num_classes
        GG = G * G
        BA = B * A
        M = BA * GG

        # ---- free (no-copy) reshapes: spatial axis G*G goes to lanes ---------
        box3 = pred_boxes.reshape(BA, 5, GG)         # [tx, ty, tw, th, unused]
        conf3 = pred_conf.reshape(BA, 1, GG)
        cls3 = pred_cls.reshape(BA, C, GG)

        # targets need one real transpose to become lane-dense (6 attrs on
        # sublanes, spatial on lanes); dtype preserved, kernel upcasts.
        # TODO(synk): producer emitting attribute-major targets removes this.
        tgt3 = jnp.transpose(targets.reshape(BA, GG, 6), (0, 2, 1))  # (BA, 6, GG)

        # tiny per-(batch, anchor) scaled anchors (8 B per B*A row)
        scaled_anchors = self.anchors / self.img_size                # (A, 2)
        anc3 = jnp.tile(scaled_anchors, (B, 1)).reshape(BA, 2, 1)    # (BA, 2, 1)

        # (tgt_xy = targets[:,:,2:4]*G and tgt_wh = targets[:,:,4:]*G are dead
        #  code in the reference -- they never feed the loss -- so we drop them.)

        # ---- tile selection ---------------------------------------------------
        TL = _choose_lane_tile(GG)
        TBA = _choose_ba_tile(BA, TL, C)
        grid = (BA // TBA, GG // TL)
        accumulate = grid[1] > 1

        kernel = functools.partial(_yolo_loss_kernel, accumulate=accumulate)

        out = pl.pallas_call(
            kernel,
            out_shape=jax.ShapeDtypeStruct((BA, 1, TL), jnp.float32),
            grid_spec=pltpu.PrefetchScalarGridSpec(
                num_scalar_prefetch=0,
                grid=grid,
                in_specs=[
                    pl.BlockSpec((TBA, 2, 1), lambda i, j: (i, 0, 0)),   # anchors
                    pl.BlockSpec((TBA, 5, TL), lambda i, j: (i, 0, j)),  # boxes
                    pl.BlockSpec((TBA, 1, TL), lambda i, j: (i, 0, j)),  # conf
                    pl.BlockSpec((TBA, C, TL), lambda i, j: (i, 0, j)),  # cls
                    pl.BlockSpec((TBA, 6, TL), lambda i, j: (i, 0, j)),  # targets
                ],
                out_specs=pl.BlockSpec((TBA, 1, TL), lambda i, j: (i, 0, 0)),
            ),
            compiler_params=pltpu.CompilerParams(
                # B*A-block axis writes disjoint output rows -> megacore
                # splittable on v7x; the spatial-tile axis (if >1) is the
                # in-place reduction.
                dimension_semantics=("parallel", "arbitrary"),
            ),
        )(anc3, box3, conf3, cls3, tgt3)

        # final cross-lane reduction + mean happen once, outside the kernel
        return jnp.sum(out) * (1.0 / M)


def _reference_loss(predictions, targets, anchors, num_classes, img_size):
    """Pure-JAX reference with the same (intended) semantics, for a sanity check."""
    pred_boxes, pred_conf, pred_cls = predictions
    B = pred_boxes.shape[0]
    G = pred_boxes.shape[3]
    A = anchors.shape[0]
    C = num_classes
    M = B * A * G * G

    box = pred_boxes.reshape(B, A, 5, G, G)[:, :, :4]
    box2d = jnp.transpose(box, (0, 1, 3, 4, 2)).reshape(M, 4)
    conf2d = pred_conf.reshape(M)
    cls2d = jnp.transpose(pred_cls.reshape(B, A, C, G, G), (0, 1, 3, 4, 2)).reshape(M, C)
    tgt2d = targets.reshape(M, 6)
    anc2d = jnp.broadcast_to((anchors / img_size)[None, :, None, None, :],
                             (B, A, G, G, 2)).reshape(M, 2)

    pred_xy = jax.nn.sigmoid(box2d[:, 0:2])
    pred_wh = jnp.exp(box2d[:, 2:4]) * anc2d
    pred_box = jnp.concatenate([pred_xy, pred_wh], axis=-1)

    tgt_conf = tgt2d[:, 0]
    tgt_cls = tgt2d[:, 1].astype(jnp.int32)
    tgt_box = tgt2d[:, 2:6]

    z, y = conf2d, tgt_conf
    conf_loss = jnp.maximum(z, 0.0) - z * y + jnp.log1p(jnp.exp(-jnp.abs(z)))
    obj = tgt_conf[:, None]
    loc_loss = jnp.sum((pred_box * obj - tgt_box * obj) ** 2, axis=-1)
    cls_loss = (jax.scipy.special.logsumexp(cls2d, axis=-1)
                - jnp.take_along_axis(cls2d, tgt_cls[:, None], axis=-1)[:, 0])
    return jnp.mean(conf_loss + loc_loss + cls_loss)


def _make_inputs(key, B, A, C, G):
    N = A * G * G
    k1, k2, k3, k4, k5, k6 = jax.random.split(key, 6)
    pred_boxes = 0.5 * jax.random.normal(k1, (B, A * 5, G, G), dtype=jnp.float32)
    pred_conf = jax.random.normal(k2, (B, A, G, G), dtype=jnp.float32)
    pred_cls = jax.random.normal(k3, (B, A * C, G, G), dtype=jnp.float32)
    tgt_conf = (jax.random.uniform(k4, (B, N, 1)) < 0.3).astype(jnp.float32)
    tgt_cls = jax.random.randint(k5, (B, N, 1), 0, C).astype(jnp.float32)
    tgt_xywh = jax.random.uniform(k6, (B, N, 4), dtype=jnp.float32)
    targets = jnp.concatenate([tgt_conf, tgt_cls, tgt_xywh], axis=-1)   # (B, N, 6)
    return (pred_boxes, pred_conf, pred_cls), targets


if __name__ == "__main__":
    key = jax.random.PRNGKey(0)
    img_size = 416

    # ---- test 1: small multi-anchor head (single spatial tile, BA blocked) ----
    B, A, C, G = 2, 3, 8, 8
    anchors = jnp.array([[10.0, 13.0], [16.0, 30.0], [33.0, 23.0]], dtype=jnp.float32)
    k1, k2 = jax.random.split(key)
    preds, targets = _make_inputs(k1, B, A, C, G)

    loss_mod = YOLOv3LossPallas(num_classes=C, anchors=anchors, img_size=img_size)
    loss = jax.block_until_ready(loss_mod(preds, targets))
    ref = jax.block_until_ready(_reference_loss(preds, targets, anchors, C, img_size))
    assert jnp.allclose(loss, ref, rtol=2e-4, atol=2e-4), (loss, ref)

    # ---- test 2: large spatial plane (exercises the accumulate / multi-tile path)
    B2, A2, C2, G2 = 1, 1, 4, 128                 # G*G = 16384 > 4096 lane-tile cap
    anchors2 = jnp.array([[30.0, 61.0]], dtype=jnp.float32)
    preds2, targets2 = _make_inputs(k2, B2, A2, C2, G2)

    loss_mod2 = YOLOv3LossPallas(num_classes=C2, anchors=anchors2, img_size=img_size)
    loss2 = jax.block_until_ready(loss_mod2(preds2, targets2))
    ref2 = jax.block_until_ready(_reference_loss(preds2, targets2, anchors2, C2, img_size))
    assert jnp.allclose(loss2, ref2, rtol=2e-4, atol=2e-4), (loss2, ref2)

    print("KERNEL_OK")
</pallas_src>

<mosaic_0001>
module attributes {stable_mosaic.version = 11 : i64} {
  func.func @_yolo_loss_kernel(%arg0: i32, %arg1: i32, %arg2: memref<3x2x1xf32, #tpu.memory_space<vmem>>, %arg3: memref<3x5x64xf32, #tpu.memory_space<vmem>>, %arg4: memref<3x1x64xf32, #tpu.memory_space<vmem>>, %arg5: memref<3x8x64xf32, #tpu.memory_space<vmem>>, %arg6: memref<3x6x64xf32, #tpu.memory_space<vmem>>, %arg7: memref<3x1x64xf32, #tpu.memory_space<vmem>>) attributes {dimension_semantics = [#tpu.dimension_semantics<parallel>, #tpu.dimension_semantics<arbitrary>], iteration_bounds = array<i64: 2, 1>, scalar_prefetch = 0 : i64, scratch_operands = 0 : i64, tpu.core_type = #tpu.core_type<tc>, window_params = [{transform_indices = @transform_0, window_bounds = array<i64: 3, 2, 1>}, {transform_indices = @transform_1, window_bounds = array<i64: 3, 5, 64>}, {transform_indices = @transform_2, window_bounds = array<i64: 3, 1, 64>}, {transform_indices = @transform_3, window_bounds = array<i64: 3, 8, 64>}, {transform_indices = @transform_4, window_bounds = array<i64: 3, 6, 64>}, {transform_indices = @transform_5, window_bounds = array<i64: 3, 1, 64>}]} {
    %c0 = arith.constant 0 : index
    %c0_0 = arith.constant 0 : index
    %c0_1 = arith.constant 0 : index
    %0 = vector.load %arg3[%c0, %c0_0, %c0_1] : memref<3x5x64xf32, #tpu.memory_space<vmem>>, vector<3x5x64xf32>
    %c0_2 = arith.constant 0 : index
    %c0_3 = arith.constant 0 : index
    %c0_4 = arith.constant 0 : index
    %1 = vector.load %arg4[%c0_2, %c0_3, %c0_4] : memref<3x1x64xf32, #tpu.memory_space<vmem>>, vector<3x1x64xf32>
    %c0_5 = arith.constant 0 : index
    %c0_6 = arith.constant 0 : index
    %c0_7 = arith.constant 0 : index
    %2 = vector.load %arg5[%c0_5, %c0_6, %c0_7] : memref<3x8x64xf32, #tpu.memory_space<vmem>>, vector<3x8x64xf32>
    %c0_8 = arith.constant 0 : index
    %c0_9 = arith.constant 0 : index
    %c0_10 = arith.constant 0 : index
    %3 = vector.load %arg6[%c0_8, %c0_9, %c0_10] : memref<3x6x64xf32, #tpu.memory_space<vmem>>, vector<3x6x64xf32>
    %c0_11 = arith.constant 0 : index
    %c0_12 = arith.constant 0 : index
    %c0_13 = arith.constant 0 : index
    %4 = vector.load %arg2[%c0_11, %c0_12, %c0_13] : memref<3x2x1xf32, #tpu.memory_space<vmem>>, vector<3x2x1xf32>
    %5 = vector.extract_strided_slice %0 {offsets = [0, 0, 0], sizes = [3, 2, 64], strides = [1, 1, 1]} : vector<3x5x64xf32> to vector<3x2x64xf32>
    %6 = arith.negf %5 : vector<3x2x64xf32>
    %7 = math.exp %6 : vector<3x2x64xf32>
    %cst = arith.constant 1.000000e+00 : f32
    %8 = vector.broadcast %cst : f32 to vector<3x2x64xf32>
    %9 = arith.addf %8, %7 : vector<3x2x64xf32>
    %10 = arith.divf %8, %9 : vector<3x2x64xf32>
    %11 = vector.extract_strided_slice %0 {offsets = [0, 2, 0], sizes = [3, 2, 64], strides = [1, 1, 1]} : vector<3x5x64xf32> to vector<3x2x64xf32>
    %12 = math.exp %11 : vector<3x2x64xf32>
    %13 = vector.broadcast %4 : vector<3x2x1xf32> to vector<3x2x64xf32>
    %14 = arith.mulf %12, %13 : vector<3x2x64xf32>
    %15 = vector.extract_strided_slice %3 {offsets = [0, 0, 0], sizes = [3, 1, 64], strides = [1, 1, 1]} : vector<3x6x64xf32> to vector<3x1x64xf32>
    %16 = vector.extract_strided_slice %3 {offsets = [0, 1, 0], sizes = [3, 1, 64], strides = [1, 1, 1]} : vector<3x6x64xf32> to vector<3x1x64xf32>
    %17 = vector.extract_strided_slice %3 {offsets = [0, 2, 0], sizes = [3, 2, 64], strides = [1, 1, 1]} : vector<3x6x64xf32> to vector<3x2x64xf32>
    %18 = vector.extract_strided_slice %3 {offsets = [0, 4, 0], sizes = [3, 2, 64], strides = [1, 1, 1]} : vector<3x6x64xf32> to vector<3x2x64xf32>
    %cst_14 = arith.constant 0.000000e+00 : f32
    %19 = vector.broadcast %cst_14 : f32 to vector<3x1x64xf32>
    %20 = arith.maximumf %1, %19 : vector<3x1x64xf32>
    %21 = arith.mulf %1, %15 : vector<3x1x64xf32>
    %22 = arith.subf %20, %21 : vector<3x1x64xf32>
    %23 = math.absf %1 : vector<3x1x64xf32>
    %cst_15 = arith.constant 0.000000e+00 : f32
    %24 = vector.broadcast %cst_15 : f32 to vector<3x1x64xf32>
    %25 = arith.subf %24, %23 : vector<3x1x64xf32>
    %26 = math.exp %25 : vector<3x1x64xf32>
    %cst_16 = arith.constant 1.000000e+00 : f32
    %27 = vector.broadcast %cst_16 : f32 to vector<3x1x64xf32>
    %28 = arith.addf %27, %26 : vector<3x1x64xf32>
    %29 = math.log %28 : vector<3x1x64xf32>
    %30 = arith.addf %22, %29 : vector<3x1x64xf32>
    %31 = arith.subf %10, %17 : vector<3x2x64xf32>
    %32 = vector.broadcast %15 : vector<3x1x64xf32> to vector<3x2x64xf32>
    %33 = arith.mulf %31, %32 : vector<3x2x64xf32>
    %34 = arith.subf %14, %18 : vector<3x2x64xf32>
    %35 = vector.broadcast %15 : vector<3x1x64xf32> to vector<3x2x64xf32>
    %36 = arith.mulf %34, %35 : vector<3x2x64xf32>
    %37 = arith.mulf %33, %33 : vector<3x2x64xf32>
    %38 = arith.mulf %36, %36 : vector<3x2x64xf32>
    %39 = arith.addf %37, %38 : vector<3x2x64xf32>
    %cst_17 = arith.constant dense<0.000000e+00> : vector<3x64xf32>
    %40 = vector.multi_reduction <add>, %39, %cst_17 [1] : vector<3x2x64xf32> to vector<3x64xf32>
    %41 = vector.shape_cast %40 : vector<3x64xf32> to vector<3x1x64xf32>
    %cst_18 = arith.constant dense<0xFF800000> : vector<3x64xf32>
    %42 = vector.multi_reduction <maximumf>, %2, %cst_18 [1] : vector<3x8x64xf32> to vector<3x64xf32>
    %43 = vector.shape_cast %42 : vector<3x64xf32> to vector<3x1x64xf32>
    %44 = vector.broadcast %43 : vector<3x1x64xf32> to vector<3x8x64xf32>
    %45 = arith.subf %2, %44 : vector<3x8x64xf32>
    %46 = math.exp %45 : vector<3x8x64xf32>
    %cst_19 = arith.constant dense<0.000000e+00> : vector<3x64xf32>
    %47 = vector.multi_reduction <add>, %46, %cst_19 [1] : vector<3x8x64xf32> to vector<3x64xf32>
    %48 = vector.shape_cast %47 : vector<3x64xf32> to vector<3x1x64xf32>
    %49 = math.log %48 : vector<3x1x64xf32>
    %50 = arith.addf %43, %49 : vector<3x1x64xf32>
    %51 = tpu.iota {dimensions = array<i32: 1>} : vector<3x8x64xi32>
    %52 = arith.fptosi %16 : vector<3x1x64xf32> to vector<3x1x64xi32>
    %53 = vector.broadcast %52 : vector<3x1x64xi32> to vector<3x8x64xi32>
    %54 = arith.cmpi eq, %51, %53 : vector<3x8x64xi32>
    %55 = arith.extui %54 : vector<3x8x64xi1> to vector<3x8x64xi32>
    %56 = arith.sitofp %55 : vector<3x8x64xi32> to vector<3x8x64xf32>
    %57 = arith.mulf %2, %56 : vector<3x8x64xf32>
    %cst_20 = arith.constant dense<0.000000e+00> : vector<3x64xf32>
    %58 = vector.multi_reduction <add>, %57, %cst_20 [1] : vector<3x8x64xf32> to vector<3x64xf32>
    %59 = vector.shape_cast %58 : vector<3x64xf32> to vector<3x1x64xf32>
    %60 = arith.subf %50, %59 : vector<3x1x64xf32>
    %61 = arith.addf %30, %41 : vector<3x1x64xf32>
    %62 = arith.addf %61, %60 : vector<3x1x64xf32>
    %c0_21 = arith.constant 0 : index
    %c0_22 = arith.constant 0 : index
    %c0_23 = arith.constant 0 : index
    %63 = vector.load %arg7[%c0_21, %c0_22, %c0_23] : memref<3x1x64xf32, #tpu.memory_space<vmem>>, vector<3x1x64xf32>
    tpu.vector_store %arg7[%c0_21, %c0_22, %c0_23], %62 {strides = array<i32>} : memref<3x1x64xf32, #tpu.memory_space<vmem>>, vector<3x1x64xf32>,
    return
  }
  func.func @transform_0(%arg0: i32, %arg1: i32) -> (i32, i32, i32) {
    %c0_i32 = arith.constant 0 : i32
    %c0_i32_0 = arith.constant 0 : i32
    %c0_i32_1 = arith.constant 0 : i32
    return %arg0, %c0_i32, %c0_i32_0 : i32, i32, i32
  }
  func.func @transform_1(%arg0: i32, %arg1: i32) -> (i32, i32, i32) {
    %c0_i32 = arith.constant 0 : i32
    %c0_i32_0 = arith.constant 0 : i32
    return %arg0, %c0_i32, %arg1 : i32, i32, i32
  }
  func.func @transform_2(%arg0: i32, %arg1: i32) -> (i32, i32, i32) {
    %c0_i32 = arith.constant 0 : i32
    %c0_i32_0 = arith.constant 0 : i32
    return %arg0, %c0_i32, %arg1 : i32, i32, i32
  }
  func.func @transform_3(%arg0: i32, %arg1: i32) -> (i32, i32, i32) {
    %c0_i32 = arith.constant 0 : i32
    %c0_i32_0 = arith.constant 0 : i32
    return %arg0, %c0_i32, %arg1 : i32, i32, i32
  }
  func.func @transform_4(%arg0: i32, %arg1: i32) -> (i32, i32, i32) {
    %c0_i32 = arith.constant 0 : i32
    %c0_i32_0 = arith.constant 0 : i32
    return %arg0, %c0_i32, %arg1 : i32, i32, i32
  }
  func.func @transform_5(%arg0: i32, %arg1: i32) -> (i32, i32, i32) {
    %c0_i32 = arith.constant 0 : i32
    %c0_i32_0 = arith.constant 0 : i32
    %c0_i32_1 = arith.constant 0 : i32
    return %arg0, %c0_i32, %c0_i32_0 : i32, i32, i32
  }
}

</mosaic_0001>

<bundles_post_ra>
// kernel: tpu_custom_call.1
= control target key start
LH: loop header
LB: loop body
LE: loop exit
PB: predicated region body
PF: predicated region fallthrough
CT: control target
= control target key end

     0   :  { %10 = vsyncpa [#allocation3], 0  ;;  %s1258_s0 = inlined_call_operand.vmem [shape: f32[6,2,1], index: 0, kind: input, shape index: {}]   ;;  %s1259_s1 = inlined_call_operand.vmem [shape: f32[6,5,64], index: 1, kind: input, shape index: {}]   ;;  %s1260_s2 = inlined_call_operand.vmem [shape: f32[6,1,64], index: 2, kind: input, shape index: {}]   ;;  %s1261_s3 = inlined_call_operand.vmem [shape: f32[6,8,64], index: 3, kind: input, shape index: {}]   ;;  %s1262_s4 = inlined_call_operand.vmem [shape: f32[6,6,64], index: 4, kind: input, shape index: {}]   ;;  %s1263_s5 = inlined_call_operand.hbm [shape: f32[6,1,64], index: 5, kind: output, shape index: {}]  }
   0x1   :  { %12 = vsyncpa [#allocation3 + $0x1], 0  ;;  %s1042_s18 = smov 0   ;;  %s1044_s19 = smov 0  }
   0x2   :  { %s1046_s20 = smov 0   ;;  %s1048_s21 = smov 0  }
   0x3   :  { %s1050_s22 = smov 0   ;;  %s1052_s23 = smov 0  }
   0x4 LB: > { %s798_s24 = sadd.s32 4294967295, %s1005_s23   ;;  %s799_s25 = sadd.s32 4294967294, %s1005_s23   ;;  %s1005_s23 = sphi %s1052_s23, %s18_s23   ;;  %s1001_s22 = sphi %s1050_s22, %s1270_s22   ;;  %s997_s21 = sphi %s1048_s21, %s1269_s21   ;;  %s993_s20 = sphi %s1046_s20, %s1268_s20   ;;  %s989_s19 = sphi %s1044_s19, %s1267_s19   ;;  %s985_s18 = sphi %s1042_s18, %s1266_s18  }
   0x5   : > { %s30_s26 = sadd.s32 1, %s1001_s22  ;;  %s175_s27 = sadd.s32 1, %s993_s20 }
   0x6   : > { %p32_p0 = scmp.ge.s32.totalorder %s30_s26, 2  ;;  %p185_p1 = scmp.ne.s32.totalorder %s993_s20, %s989_s19 }
   0x7   : > { %p186_p2 = scmp.eq.s32.totalorder %s798_s24, 1  ;;  %p191_p3 = scmp.ne.s32.totalorder %s989_s19, %s985_s18 }
   0x8   : > { %s1272_s26 = smov (%p32_p0, %s30_s26), 0  ;;  %p192_p5 = scmp.eq.s32.totalorder %s799_s25, 1 }
   0x9   : > { %p1082_p4 = por %p186_p2, %p185_p1  ;;  %s172_s29 = ssub.s32 %s1001_s22, %s1272_s26 }
   0xa   : > { %p802_p6 = scmp.ge.s32.totalorder %s1005_s23, 1  ;;  %p173_p7 = scmp.eq.s32.totalorder %s172_s29, 0 }
   0xb   : > { %p1089_p8 = por %p192_p5, %p191_p3  ;;  %p266_p9 = scmp.lt.s32.totalorder %s1005_s23, 3 }
   0xc   : > { %s1095_s6 = scalar_select %p173_p7, %s993_s20, %s175_s27  }
   0xd   : > { %p267_p10 = pnand %p802_p6, %p266_p9 }
   0xe   : > { %s325_s7 = smul.u32 (!%p267_p10), 3, %s997_s21  ;;  %v1007_v0 = vmov (!%p267_p10), 0   ;;  %vm533_vm0 = vcmask (!%p267_p10), 523264   ;;  %v472_v43 = vlaneseq (!%p267_p10)  ;;  %vm511_vm4 = vcmask (!%p267_p10), 517120   ;;  %s1009_s25 = smov (!%p267_p10), [#allocation2]  }
   0xf   : > { %270 = sbr.rel (%p267_p10) target bundleno = 204 (0xcc), region = 40  ;;  %884 = vset.pattern.permute.xlu1 (!%p267_p10), %v1007_v0  ;;  %883 = vset.pattern.permute.xlu0 (!%p267_p10), %v1007_v0  ;;  %vm653_vm5 = vcmask (!%p267_p10), 516096   ;;  %s931_s27 = sshll.u32 (!%p267_p10), %s1009_s25, 4  ;;  %s932_s27 = int_to_ptr.vmem [resolvable:$false] %s931_s27 }
  0x10   : > { %p326_p11 = scmp.lt.s32.totalorder (!%p267_p10), %s325_s7, 5  ;;  %v473_v51 = vshrl.u32 (!%p267_p10), %v472_v43, 7 }
  0x12   : > { %v601_v57 = vsub.s32 (!%p267_p10), 1, %v473_v51 }
  0x16   : > { %s1274_s7 = smov (!%p326_p11, %s325_s7), 5 }
  0x17   : > { %s803_s8 = sshll.u32 %s1274_s7, 1  ;;  %s1105_s12 = sshll.u32 %s1274_s7, 3 }
  0x18   : > { %s329_s11 = scalar_lea.vmem %s1258_s0, %s803_s8  ;;  %s355_s15 = scalar_lea.vmem %s1261_s3, %s1105_s12 }
  0x19   : > { %v381_v1 = vld [vmem:[%s329_s11 + $0x4] sm:$0x3]  ;;  %v379_v2 = vld [vmem:[%s329_s11] sm:$0x3]  ;;  %v380_v3 = vld [vmem:[%s329_s11 + $0x2] sm:$0x3]  ;;  %s338_s24 = scalar_lea.vmem %s1259_s1, %s1105_s12  ;;  %s346_s29 = scalar_lea.vmem %s1260_s2, %s1274_s7 }
  0x1a   : > { %416 = vperm.xlu1 %884, %v381_v1   ;;  %408 = vperm.xlu0 %883, %v379_v2   ;;  %v1111_v4 = vld [vmem:[%s355_s15] sm:$0xff]  ;;  %v1113_v5 = vld [vmem:[%s355_s15 + $0x10] sm:$0xff]  ;;  %v1117_v7 = vld [vmem:[%s355_s15 + $0x8] sm:$0xff]  ;;  %s364_s10 = scalar_lea.vmem %s1262_s4, %s1105_s12  ;;  %s322_s7 = sand.u32 1, %s989_s19  }
  0x1b   : > { %v534_v6 = vsel %vm533_vm0, %v1111_v4, -inf  ;;  %v548_v8 = vsel %vm533_vm0, %v1113_v5, -inf  ;;  %v541_v10 = vsel %vm533_vm0, %v1117_v7, -inf  ;;  %v369_v33 = vld [vmem:[%s338_s24 + $0x10] sm:$0x1f]  ;;  %s817_s11 = smul.u32 3, %s322_s7 }
  0x1c   : > { %v535_v9 = vrot.slane %v534_v6, 4  ;;  %v549_v11 = vrot.slane %v548_v8, 4  ;;  %v542_v13 = vrot.slane %v541_v10, 4  ;;  %v367_v34 = vld [vmem:[%s338_s24] sm:$0x1f]  ;;  %s816_s12 = smul.u32 48, %s997_s21 }
  0x1d   : > { %v809_v36 = vmul.f32 -1.442695, %v369_v33  ;;  %v807_v37 = vmul.f32 -1.442695, %v367_v34  ;;  %v1143_v38 = vld [vmem:[%s338_s24 + $0x8] sm:$0x1f] }
  0x1e   : > { %412 = vperm.xlu0 %883, %v380_v3   ;;  %v536_v12 = vmax.f32 %v534_v6, %v535_v9  ;;  %v550_v14 = vmax.f32 %v548_v8, %v549_v11  ;;  %v543_v16 = vmax.f32 %v541_v10, %v542_v13  ;;  %v1145_v39 = vld [vmem:[%s346_s29] sm:$0x1]  ;;  %v1147_v40 = vld [vmem:[%s346_s29 + $0x2] sm:$0x1]  ;;  %v808_v41 = vmul.f32 -1.442695, %v1143_v38  ;;  %s1206_s17 = scalar_lea.hbm %s1263_s5, %s816_s12 }
  0x1f   : > { %v436_v42 = vand.u32 2147483647, %v1145_v39  ;;  %v438_v44 = vand.u32 2147483647, %v1147_v40  ;;  %v1156_v45 = vld [vmem:[%s364_s10 + $0x10] sm:$0x3f] }
  0x20   : > { %v537_v15 = vrot.slane %v536_v12, 2  ;;  %v551_v17 = vrot.slane %v550_v14, 2  ;;  %v544_v19 = vrot.slane %v543_v16, 2  ;;  %v1158_v46 = vld [vmem:[%s364_s10] sm:$0x3f]  ;;  %v822_v47 = vtrunc.f32 %v1156_v45  ;;  %s324_s13 = scalar_lea.vmem [#allocation2], %s817_s11 }
  0x21   : > { %v818_v48 = vtrunc.f32 %v1158_v46  ;;  %v1162_v52 = vld [vmem:[%s346_s29 + $0x1] sm:$0x1]  ;;  %v439_v53 = vsub.f32 0.0, %v436_v42  ;;  %v441_v54 = vsub.f32 0.0, %v438_v44  ;;  %v1165_v59 = vld [vmem:[%s364_s10 + $0x8] sm:$0x3f] }
  0x22   : > { %v538_v18 = vmax.f32 %v536_v12, %v537_v15  ;;  %v552_v20 = vmax.f32 %v550_v14, %v551_v17  ;;  %v545_v22 = vmax.f32 %v543_v16, %v544_v19  ;;  %v823_v56 = vcvt.f32.s32 %v822_v47  ;;  %s671_s14 = sshll.u32 %s324_s13, 4  ;;  %s1212_s21 = scalar_lea.sflag [#allocation3], %s322_s7  ;;  %s1208_s14 = int_to_ptr.vmem [resolvable:$true] %s671_s14 }
  0x23   : > { %v819_v58 = vcvt.f32.s32 %v818_v48  ;;  %v820_v62 = vtrunc.f32 %v1165_v59  ;;  %v437_v0 = vand.u32 2147483647, %v1162_v52  ;;  %v442_v2 = vmul.f32 1.442695, %v439_v53  ;;  %s927_s24 = scalar_lea.vmem %s1208_s14, 48  ;;  %s933_s29 = scalar_lea.vmem %s932_s27, 96 }
  0x24   : > { %v539_v21 = vrot.slane %v538_v18, 1  ;;  %v553_v23 = vrot.slane %v552_v20, 1  ;;  %v546_v25 = vrot.slane %v545_v22, 1  ;;  %v446_v3 = vmul.f32 1.442695, %v441_v54  ;;  %p928_p12 = scmp.ne.s32.totalorder %s1208_s14, %s927_s24  ;;  %p934_p1 = scmp.lt.s32.totalorder %s1208_s14, %s932_s27 }
  0x25   : > { %v610_v10 = vrot.slane %v823_v56, %v601_v57  ;;  %v602_v11 = vrot.slane %v819_v58, %v601_v57  ;;  %v821_v13 = vcvt.f32.s32 %v820_v62  ;;  %v440_v14 = vsub.f32 0.0, %v437_v0  ;;  %p935_p2 = scmp.lt.s32.totalorder %s933_s29, %s927_s24 }
  0x26   : > { %v1123_v24 = vmax.f32 %v538_v18, %v539_v21  ;;  %v1125_v26 = vmax.f32 %v552_v20, %v553_v23  ;;  %v1127_v27 = vmax.f32 %v545_v22, %v546_v25  ;;  %v404_v19 = vmul.f32 1.442695, %v369_v33  ;;  %p929_p13 = pnand %p928_p12, %p1082_p4 }
  0x27   : > { %vm613_vm1 = vcmp.eq.s32.totalorder %v473_v51, %v610_v10  ;;  %vm611_vm2 = vcmp.eq.s32.totalorder %v473_v51, %v602_v11  ;;  %v400_v21 = vmul.f32 1.442695, %v367_v34  ;;  %v606_v22 = vrot.slane %v821_v13, %v601_v57  ;;  %p936_p3 = por %p935_p2, %p934_p1 }
  0x28   : > { %v555_v28 = vsub.f32 %v1111_v4, %v1123_v24  ;;  %v557_v29 = vsub.f32 %v1113_v5, %v1125_v26  ;;  %v556_v30 = vsub.f32 %v1117_v7, %v1127_v27  ;;  %v402_v33 = vmul.f32 1.442695, %v1143_v38  ;;  %p930_p0 = pneg %p929_p13 }
  0x29   : > { %vm612_vm3 = vcmp.eq.s32.totalorder %v473_v51, %v606_v22  ;;  %v474_v48 = vsub.s32 0, %v473_v51  ;;  %v465_v56 = vrot.slane %v1156_v45, 2 }
  0x2a   : > { %v558_v31 = vmul.f32 1.442695, %v555_v28  ;;  %v562_v32 = vmul.f32 1.442695, %v557_v29  ;;  %v560_v35 = vmul.f32 1.442695, %v556_v30  ;;  %p937_p5 = pnand %p936_p3, %p930_p0 }
  0x2b   : > { %v1008_v29 = vmov 0.0   ;;  %v475_v0 = vrot.slane %v1158_v46, %v474_v48 }
  0x2c   : > { %885 = vpow2.f32 %v558_v31  ;;  %v812_v30 = vsel %vm613_vm1, 1.0, %v1008_v29  ;;  %v810_v31 = vsel %vm611_vm2, 1.0, %v1008_v29  ;;  %v811_v43 = vsel %vm612_vm3, 1.0, %v1008_v29 }
  0x2d   : > { %887 = vpow2.f32 %v562_v32  ;;  %v444_v32 = vmul.f32 1.442695, %v440_v14  ;;  %v464_v14 = vrot.slane %v1165_v59, 2 }
  0x2e   : > { %889 = vpow2.f32 %v560_v35 }
  0x2f   : > { %891 = vpow2.f32 %v809_v36  ;;  %v622_v36 = vmul.f32 %v812_v30, %v1113_v5  ;;  %v621_v5 = vmul.f32 %v811_v43, %v1117_v7 }
  0x30   : > { %893 = vpow2.f32 %v807_v37  ;;  %v620_v37 = vmul.f32 %v810_v31, %v1111_v4 }
  0x31   : > { %895 = vpow2.f32 %v808_v41 }
  0x32   : > { %897 = vpow2.f32 %v442_v2 }
  0x33   : > { %899 = vpow2.f32 %v446_v3 }
  0x36   : > { %v886_v49 = vpop.eup %885 }
  0x37   : > { %v888_v50 = vpop.eup %887  ;;  %v564_v55 = vsel %vm533_vm0, %v886_v49, 0.0  ;;  %v637_v49 = vsel %vm533_vm0, %v622_v36, 0.0 }
  0x38   : > { %v890_v60 = vpop.eup %889  ;;  %v578_v61 = vsel %vm533_vm0, %v888_v50, 0.0  ;;  %v565_v6 = vrot.slane %v564_v55, 4  ;;  %v623_v50 = vsel %vm533_vm0, %v620_v37, 0.0  ;;  %v638_v58 = vrot.slane %v637_v49, 4 }
  0x39   : > { %v892_v63 = vpop.eup %891  ;;  %v571_v8 = vsel %vm533_vm0, %v890_v60, 0.0  ;;  %v579_v9 = vrot.slane %v578_v61, 4  ;;  %v463_v60 = vrot.slane %v1158_v46, 2  ;;  %v479_v37 = vrot.slane %v1165_v59, %v474_v48 }
  0x3a   : > { %v894_v1 = vpop.eup %893  ;;  %v393_v12 = vadd.f32 1.0, %v892_v63  ;;  %v566_v17 = vadd.f32 %v565_v6, %v564_v55  ;;  %v572_v18 = vrot.slane %v571_v8, 4  ;;  %v483_v63 = vrot.slane %v1156_v45, %v474_v48 }
  0x3b   : > { %v391_v15 = vadd.f32 1.0, %v894_v1  ;;  %v896_v16 = vpop.eup %895  ;;  %v580_v20 = vadd.f32 %v579_v9, %v578_v61  ;;  %v624_v61 = vrot.slane %v623_v50, 4  ;;  %v630_v9 = vsel %vm533_vm0, %v621_v5, 0.0 }
  0x3c   : > { %901 = vrcp.f32 %v393_v12  ;;  %v392_v23 = vadd.f32 1.0, %v896_v16  ;;  %v567_v25 = vrot.slane %v566_v17, 2  ;;  %v573_v28 = vadd.f32 %v572_v18, %v571_v8  ;;  %v898_v44 = vpop.eup %897 }
  0x3d   : > { %903 = vrcp.f32 %v391_v15  ;;  %v581_v35 = vrot.slane %v580_v20, 2  ;;  %v900_v47 = vpop.eup %899  ;;  %v448_v57 = vadd.f32 1.0, %v898_v44  ;;  %v639_v16 = vadd.f32 %v638_v58, %v637_v49 }
  0x3e   : > { %905 = vpow2.f32 %v404_v19  ;;  %v568_v34 = vadd.f32 %v567_v25, %v566_v17  ;;  %v574_v41 = vrot.slane %v573_v28, 2  ;;  %v450_v15 = vadd.f32 1.0, %v900_v47 }
  0x3f   : > { %907 = vpow2.f32 %v400_v21  ;;  %v582_v42 = vadd.f32 %v581_v35, %v580_v20  ;;  %v625_v17 = vadd.f32 %v624_v61, %v623_v50  ;;  %v631_v22 = vrot.slane %v630_v9, 4 }
  0x40   : > { %909 = vrcp.f32 %v392_v23  ;;  %v569_v53 = vrot.slane %v568_v34, 1  ;;  %v575_v54 = vadd.f32 %v574_v41, %v573_v28  ;;  %v640_v36 = vrot.slane %v639_v16, 2 }
  0x41   : > { %911 = vpow2.f32 %v444_v32  ;;  %v583_v55 = vrot.slane %v582_v42, 1  ;;  %v626_v41 = vrot.slane %v625_v17, 2  ;;  %v632_v49 = vadd.f32 %v631_v22, %v630_v9 }
  0x42   : > { %913 = vpow2.f32 %v402_v33  ;;  %v570_v2 = vadd.f32 %v569_v53, %v568_v34  ;;  %v576_v3 = vrot.slane %v575_v54, 1  ;;  %v641_v5 = vadd.f32 %v640_v36, %v639_v16 }
  0x43   : > { %v584_v11 = vadd.f32 %v583_v55, %v582_v42  ;;  %915 = vlog2.f32 %v448_v57  ;;  %v429_v48 = vmax.f32 %v1147_v40, 0.0  ;;  %v432_v58 = vmul.f32 %v1156_v45, %v1147_v40 }
  0x44   : > { %v577_v25 = vadd.f32 %v576_v3, %v575_v54  ;;  %917 = vlog2.f32 %v570_v2  ;;  %v627_v61 = vadd.f32 %v626_v41, %v625_v17  ;;  %v427_v2 = vmax.f32 %v1145_v39, 0.0 }
  0x45   : > { %919 = vlog2.f32 %v584_v11  ;;  %v430_v3 = vmul.f32 %v1158_v46, %v1145_v39  ;;  %v428_v45 = vmax.f32 %v1162_v52, 0.0  ;;  %v435_v11 = vsub.f32 %v429_v48, %v432_v58 }
  0x46   : > { %v902_v38 = vpop.eup %901  ;;  %921 = vlog2.f32 %v450_v15  ;;  %v628_v17 = vrot.slane %v627_v61, 1 }
  0x47   : > { %v904_v4 = vpop.eup %903  ;;  %v471_v51 = vsub.f32 %v902_v38, %v465_v56  ;;  %923 = vlog2.f32 %v577_v25  ;;  %v433_v46 = vsub.f32 %v427_v2, %v430_v3 }
  0x48   : > { %v906_v62 = vpop.eup %905  ;;  %v469_v7 = vsub.f32 %v904_v4, %v463_v60 }
  0x49   : > { %v908_v1 = vpop.eup %907  ;;  %v486_v19 = vmul.f32 %v483_v63, %v471_v51 }
  0x4a   : > { %v910_v10 = vpop.eup %909  ;;  %v484_v28 = vmul.f32 %v475_v0, %v469_v7  ;;  %v642_v7 = vrot.slane %v641_v5, 1 }
  0x4b   : > { %v912_v18 = vpop.eup %911  ;;  %v470_v29 = vsub.f32 %v910_v10, %v464_v14  ;;  %v495_v44 = vmul.f32 %v486_v19, %v486_v19 }
  0x4c   : > { %v914_v23 = vpop.eup %913  ;;  %v449_v33 = vadd.f32 1.0, %v912_v18  ;;  %v493_v47 = vmul.f32 %v484_v28, %v484_v28 }
  0x4d   : > { %v485_v53 = vmul.f32 %v479_v37, %v470_v29  ;;  %v916_v57 = vpop.eup %915 }
  0x4e   : > { %925 = vlog2.f32 %v449_v33  ;;  %v452_v22 = vmul.f32 0.6931472, %v916_v57 }
  0x99   : > { %v417_v6 = vpop.permute.xlu1 %416  ;;  %v409_v8 = vpop.permute.xlu0 %408 }
  0x9a   : > { %v420_v12 = vrot.slane %v417_v6, 6  ;;  %v418_v13 = vrot.slane %v409_v8, 6 }
  0x9c   : > { %v426_v20 = vmul.f32 %v906_v62, %v420_v12  ;;  %v424_v21 = vmul.f32 %v908_v1, %v418_v13  ;;  %v918_v1 = vpop.eup %917 }
  0x9d   : > { %v413_v30 = vpop.permute.xlu0 %412  ;;  %v920_v6 = vpop.eup %919 }
  0x9e   : > { %v489_v31 = vsub.f32 %v426_v20, %v465_v56  ;;  %v487_v32 = vsub.f32 %v424_v21, %v463_v60  ;;  %v419_v35 = vrot.slane %v413_v30, 6  ;;  %v633_v60 = vrot.slane %v632_v49, 2  ;;  %v922_v40 = vpop.eup %921 }
  0x9f   : > { %v924_v18 = vpop.eup %923  ;;  %v590_v19 = vmul.f32 0.6931472, %v920_v6  ;;  %v643_v21 = vadd.f32 %v642_v7, %v641_v5  ;;  %v456_v29 = vmul.f32 0.6931472, %v922_v40 }
  0xa0   : > { %v492_v34 = vmul.f32 %v489_v31, %v483_v63  ;;  %v490_v42 = vmul.f32 %v487_v32, %v475_v0  ;;  %v425_v43 = vmul.f32 %v914_v23, %v419_v35  ;;  %v494_v63 = vmul.f32 %v485_v53, %v485_v53  ;;  %v926_v28 = vpop.eup %925 }
  0xa1   : > { %v634_v15 = vadd.f32 %v633_v60, %v632_v49  ;;  %v431_v23 = vmul.f32 %v1165_v59, %v1162_v52  ;;  %v588_v35 = vmul.f32 0.6931472, %v924_v18  ;;  %v457_v52 = vadd.f32 %v452_v22, %v433_v46 }
  0xa2   : > { %v498_v50 = vmul.f32 %v492_v34, %v492_v34  ;;  %v496_v38 = vmul.f32 %v490_v42, %v490_v42  ;;  %v488_v54 = vsub.f32 %v425_v43, %v464_v14  ;;  %v586_v14 = vmul.f32 0.6931472, %v918_v1 }
  0xa3   : > { %v635_v36 = vrot.slane %v634_v15, 1  ;;  %v593_v34 = vadd.f32 %v590_v19, %v1125_v26  ;;  %v434_v59 = vsub.f32 %v428_v45, %v431_v23  ;;  %v592_v53 = vadd.f32 %v588_v35, %v1127_v27 }
  0xa4   : > { %v504_v4 = vrot.slane %v498_v50, 2  ;;  %v502_v55 = vrot.slane %v496_v38, 2  ;;  %v491_v56 = vmul.f32 %v488_v54, %v479_v37  ;;  %v591_v33 = vadd.f32 %v586_v14, %v1123_v24 }
  0xa5   : > { %v629_v37 = vadd.f32 %v628_v17, %v627_v61  ;;  %v636_v24 = vadd.f32 %v635_v36, %v634_v15  ;;  %v646_v5 = vsub.f32 %v593_v34, %v643_v21 }
  0xa6   : > { %v510_v62 = vadd.f32 %v504_v4, %v495_v44  ;;  %v508_v51 = vadd.f32 %v502_v55, %v493_v47  ;;  %v497_v0 = vmul.f32 %v491_v56, %v491_v56  ;;  %v454_v44 = vmul.f32 0.6931472, %v926_v28 }
  0xa7   : > { %v459_v47 = vadd.f32 %v456_v29, %v435_v11  ;;  %v644_v54 = vsub.f32 %v591_v33, %v629_v37  ;;  %v645_v61 = vsub.f32 %v592_v53, %v636_v24 }
  0xa8   : > { %v526_v8 = vsel %vm511_vm4, %v510_v62, 0.0  ;;  %v512_v9 = vsel %vm511_vm4, %v508_v51, 0.0  ;;  %v503_v10 = vrot.slane %v497_v0, 2  ;;  %v458_v48 = vadd.f32 %v454_v44, %v434_v59 }
  0xa9   : > { %v527_v12 = vrot.slane %v526_v8, 4  ;;  %v513_v13 = vrot.slane %v512_v9, 4 }
  0xaa   : > { %v509_v16 = vadd.f32 %v503_v10, %v494_v63 }
  0xab   : > { %v528_v39 = vadd.f32 %v527_v12, %v526_v8  ;;  %v514_v20 = vadd.f32 %v513_v13, %v512_v9 }
  0xac   : > { %v519_v25 = vsel %vm511_vm4, %v509_v16, 0.0 }
  0xad   : > { %v529_v30 = vrot.slane %v528_v39, 2  ;;  %v515_v31 = vrot.slane %v514_v20, 2  ;;  %v520_v32 = vrot.slane %v519_v25, 4 }
  0xaf   : > { %v530_v41 = vadd.f32 %v529_v30, %v528_v39  ;;  %v516_v42 = vadd.f32 %v515_v31, %v514_v20  ;;  %v521_v43 = vadd.f32 %v520_v32, %v519_v25 }
  0xb1   : > { %v531_v49 = vrot.slane %v530_v41, 1  ;;  %v517_v50 = vrot.slane %v516_v42, 1  ;;  %v522_v38 = vrot.slane %v521_v43, 2 }
  0xb3   : > { %v532_v26 = vadd.f32 %v531_v49, %v530_v41  ;;  %v518_v4 = vadd.f32 %v517_v50, %v516_v42  ;;  %v523_v55 = vadd.f32 %v522_v38, %v521_v43 }
  0xb5   : > { %v649_v56 = vadd.f32 %v532_v26, %v459_v47  ;;  %v647_v57 = vadd.f32 %v518_v4, %v457_v52  ;;  %v524_v58 = vrot.slane %v523_v55, 1 }
  0xb7   : > { %v652_v60 = vadd.f32 %v649_v56, %v646_v5  ;;  %v525_v62 = vadd.f32 %v524_v58, %v523_v55  ;;  %v650_v27 = vadd.f32 %v647_v57, %v644_v54 }
  0xb9   : > { %v648_v51 = vadd.f32 %v525_v62, %v458_v48  ;;  %654 = vst.msk [vmem:[%s324_s13] sm:$0x1] %vm653_vm5, %v650_v27  ;;  %656 = vst.msk [vmem:[%s324_s13 + $0x2] sm:$0x1] %vm653_vm5, %v652_v60 }
  0xbb   : > { %v651_v63 = vadd.f32 %v648_v51, %v645_v61 }
  0xbd   : > { %655 = vst.msk [vmem:[%s324_s13 + $0x1] sm:$0x1] %vm653_vm5, %v651_v63 }
  0xbe   : > { %940 = shalt.err (!%p937_p5)
}
  0xbf   : > { %s941_s8 = scalar_lea.hbm %s1206_s17, 48  ;;  %s945_s7 = scalar_lea.hbm %s1263_s5, 96 }
  0xc0   : > { %p942_p6 = scmp.ne.s32.totalorder %s1206_s17, %s941_s8  ;;  %p946_p10 = scmp.lt.u32.totalorder %s1206_s17, %s1263_s5 }
  0xc1   : > { %p947_p11 = scmp.lt.u32.totalorder %s945_s7, %s941_s8  ;;  %p949_p13 = scmp.lt.u32.totalorder %s941_s8, %s1206_s17 }
  0xc2   : > { %p943_p7 = pnand %p942_p6, %p1082_p4 }
  0xc3   : > { %p948_p12 = por %p947_p11, %p946_p10 }
  0xc4   : > { %p944_p9 = pneg %p943_p7 }
  0xc5   : > { %p950_p0 = por %p949_p13, %p948_p12 }
  0xc7   : > { %p951_p1 = pnand %p950_p0, %p944_p9 }
  0xc9   : > { %954 = shalt.err (!%p951_p1)
}
  0xca   : > { %s1010_s13 = smov 16   ;;  %s1011_s15 = smov 1  }
  0xcb   : > { %824 = dma.vmem_to_hbm [thread:$0]  (%p1082_p4), %s1208_s14, 48, %s1206_s17, %s1212_s21, %s1010_s13, %s1010_s13, %s1011_s15  }
  0xcc PF: > { %p830_p2 = scmp.ge.s32.totalorder %s1005_s23, 2  ;;  %s686_s16 = sand.u32 1, %s985_s18  }
  0xcd   : > { %s687_s24 = scalar_lea.sflag [#allocation3], %s686_s16 }
  0xce   : > { %p827_p3 = pnand %p830_p2, %p1089_p8 }
  0xd0   : > { %980 = dma.done.wait (!%p827_p3), %s687_s24, 48  }
  0xd1   : > { %982 = vsyncadd (!%p827_p3), %s687_s24, 4294967248  ;;  %s18_s23 = sadd.s32 1, %s1005_s23   ;;  %s1266_s18 = smov %s989_s19 }
  0xd2   : > { %p15_p5 = scmp.ge.s32.totalorder %s18_s23, 4   ;;  %s1267_s19 = smov %s993_s20 }
  0xd3   : > { %s1268_s20 = smov %s1095_s6  ;;  %s1269_s21 = smov %s1001_s22 }
  0xd4   : > { %s1270_s22 = smov %s1272_s26  ;;  %17 = sbr.rel (!%p15_p5) target bundleno = 4 (0x4), region = 87 }
  0xdb   :  { %692 = vsyncpa [#allocation3], 1 }
  0xdc   :  { %694 = vsyncpa [#allocation3 + $0x1], 1 }

</bundles_post_ra>
